<compile_context>
chip_gen: v5e
topology: v5e:2x2
jax: 0.10.0
libtpu: 0.0.40
codegen_flags: <defaults>
</compile_context>

<pallas_src>
import functools

import jax
import jax.numpy as jnp
from jax.experimental import pallas as pl
from jax.experimental.pallas import tpu as pltpu


def _residual_block_kernel(x_ref, t1_ref, b1_ref, g1_ref, be1_ref,
                           t2_ref, b2_ref, g2_ref, be2_ref,
                           p_ref, pt_ref, a_ref,
                           o_ref, col_ref):
    N, H, WC = x_ref.shape
    C = g1_ref.shape[1]
    W = WC // C
    BLK = col_ref.shape[-1] // 3          # lane-aligned per-dh block stride
    M = N * H
    eps = 1e-5
    inv_cnt = 1.0 / float(M * W)

    # Zero the col scratch once.  This provides the H-direction zero padding
    # (top row of the dh=0 block, bottom row of the dh=2 block are never
    # overwritten) and zeroes the lane padding WC..BLK of each block, which
    # multiplies against zero rows of the banded weight matrix.
    col_ref[...] = jnp.zeros_like(col_ref)

    def fill_col(src):                                        # src: (N, H, W*C)
        col_ref[:, 1:, 0:WC] = src[:, :H - 1, :]               # row h-1 (dh=0)
        col_ref[:, :, BLK:BLK + WC] = src                      # row h   (dh=1)
        col_ref[:, :H - 1, 2 * BLK:2 * BLK + WC] = src[:, 1:, :]  # row h+1 (dh=2)

    def conv(t_ref, b_ref):
        colv = col_ref[...].reshape(M, 3 * BLK)
        return jnp.dot(colv, t_ref[...],
                       preferred_element_type=jnp.float32) + b_ref[...]

    def batchnorm(y, g_ref, be_ref):
        # single-pass biased batch statistics, reduced per channel via the
        # channel-pooling matrix P (W*C, C) and broadcast back via P^T.
        s_c = jnp.dot(jnp.sum(y, axis=0, keepdims=True), p_ref[...],
                      preferred_element_type=jnp.float32)      # (1, C)
        ss_c = jnp.dot(jnp.sum(y * y, axis=0, keepdims=True), p_ref[...],
                       preferred_element_type=jnp.float32)     # (1, C)
        mean = s_c * inv_cnt
        var = ss_c * inv_cnt - mean * mean
        scale_c = g_ref[...] * jax.lax.rsqrt(var + eps)        # (1, C)
        shift_c = be_ref[...] - mean * scale_c                 # (1, C)
        scale = jnp.dot(scale_c, pt_ref[...],
                        preferred_element_type=jnp.float32)    # (1, W*C)
        shift = jnp.dot(shift_c, pt_ref[...],
                        preferred_element_type=jnp.float32)    # (1, W*C)
        return y * scale + shift

    x = x_ref[...]                                             # (N, H, WC)

    # conv1 -> bn1 -> prelu
    fill_col(x)
    r = conv(t1_ref, b1_ref)                                   # (M, WC)
    r = batchnorm(r, g1_ref, be1_ref)
    a = a_ref[0]
    r = jnp.where(r >= 0, r, a * r)

    # conv2 -> bn2 (interior writes fully overwrite the first conv's cols;
    # borders / lane padding stay zero from the initial fill)
    fill_col(r.reshape(N, H, WC))
    r2 = conv(t2_ref, b2_ref)
    r2 = batchnorm(r2, g2_ref, be2_ref)

    # residual add
    o_ref[...] = x + r2.reshape(N, H, WC)


def _round_up(n, m):
    return ((n + m - 1) // m) * m


def _conv_to_band(w_hwio, W, blk):
    """(3,3,Cin,Cout) HWIO conv weights -> (3*blk, W*Cout) block-banded matrix.

    Row index = dh*blk + w_in*Cin + ci, col index = w_out*Cout + co, with a
    nonzero block w[dh, dw] wherever w_in == w_out + dw - 1 (zero-padded taps
    are simply absent).  Rows W*Cin..blk of each dh block are zero padding so
    the col buffer can use 128-lane-aligned block strides.
    """
    KH, KW, Cin, Cout = w_hwio.shape
    wc_in = W * Cin
    blocks = []
    for dh in range(KH):
        t = jnp.zeros((wc_in, W * Cout), jnp.float32)
        for dw in range(KW):
            t = t + jnp.kron(jnp.eye(W, k=1 - dw, dtype=jnp.float32),
                             w_hwio[dh, dw].astype(jnp.float32))
        if blk > wc_in:
            t = jnp.concatenate(
                [t, jnp.zeros((blk - wc_in, W * Cout), jnp.float32)], axis=0)
        blocks.append(t)
    return jnp.concatenate(blocks, axis=0)


@jax.jit
def residual_block_pallas(x_nchw, params):
    x_nchw = x_nchw.astype(jnp.float32)
    N, C, H, W = x_nchw.shape
    WC = W * C
    BLK = _round_up(WC, 128)

    # NCHW -> packed (N, H, W*C); the reshape is free (row-major NHWC flatten).
    x = jnp.transpose(x_nchw, (0, 2, 3, 1)).reshape(N, H, WC)

    t1 = _conv_to_band(params["w1"], W, BLK)                   # (3*BLK, WC)
    t2 = _conv_to_band(params["w2"], W, BLK)
    b1p = jnp.tile(params["b1"].astype(jnp.float32), W).reshape(1, WC)
    b2p = jnp.tile(params["b2"].astype(jnp.float32), W).reshape(1, WC)
    g1 = params["g1"].astype(jnp.float32).reshape(1, C)
    be1 = params["beta1"].astype(jnp.float32).reshape(1, C)
    g2 = params["g2"].astype(jnp.float32).reshape(1, C)
    be2 = params["beta2"].astype(jnp.float32).reshape(1, C)
    # channel-pooling matrix: P[w*C + c, c'] = (c == c')
    P = jnp.kron(jnp.ones((W, 1), jnp.float32), jnp.eye(C, dtype=jnp.float32))
    PT = P.T
    a = params["prelu_a"].reshape(1).astype(jnp.float32)

    vmem = pl.BlockSpec(memory_space=pltpu.MemorySpace.VMEM)
    smem = pl.BlockSpec(memory_space=pltpu.MemorySpace.SMEM)
    args = (x, t1, b1p, g1, be1, t2, b2p, g2, be2, P, PT, a)
    in_specs = [vmem] * 11 + [smem]

    out = pl.pallas_call(
        _residual_block_kernel,
        out_shape=jax.ShapeDtypeStruct((N, H, WC), jnp.float32),
        in_specs=in_specs,
        out_specs=vmem,
        scratch_shapes=[pltpu.VMEM((N, H, 3 * BLK), jnp.float32)],
        input_output_aliases={0: 0},
    )(*args)
    return jnp.transpose(out.reshape(N, H, W, C), (0, 3, 1, 2))   # back to NCHW


def init_params(key, channels):
    # Deterministic, PyTorch-default-shaped init (kaiming-uniform-ish bounds,
    # gamma=1, beta=0, PReLU a=0.25).
    k0, k1, k2, k3 = jax.random.split(key, 4)
    bound = 1.0 / (channels * 9) ** 0.5
    u = functools.partial(jax.random.uniform, dtype=jnp.float32,
                          minval=-bound, maxval=bound)
    return dict(
        w1=u(k0, (3, 3, channels, channels)),     # HWIO
        b1=u(k1, (channels,)),
        w2=u(k2, (3, 3, channels, channels)),
        b2=u(k3, (channels,)),
        g1=jnp.ones((channels,), jnp.float32),
        beta1=jnp.zeros((channels,), jnp.float32),
        g2=jnp.ones((channels,), jnp.float32),
        beta2=jnp.zeros((channels,), jnp.float32),
        prelu_a=jnp.array([0.25], jnp.float32),
    )


def residual_block_ref(x_nchw, p):
    # Pure-JAX reference (same semantics) for verification.
    x = jnp.transpose(x_nchw, (0, 2, 3, 1)).astype(jnp.float32)

    def conv(y, w, b):
        y = jax.lax.conv_general_dilated(
            y, w, (1, 1), "SAME",
            dimension_numbers=("NHWC", "HWIO", "NHWC"),
            precision=jax.lax.Precision.HIGHEST)
        return y + b

    def bn(y, g, be):
        m = jnp.mean(y, axis=(0, 1, 2), keepdims=True)
        v = jnp.mean((y - m) ** 2, axis=(0, 1, 2), keepdims=True)
        return (y - m) / jnp.sqrt(v + 1e-5) * g + be

    r = conv(x, p["w1"], p["b1"])
    r = bn(r, p["g1"], p["beta1"])
    a = p["prelu_a"][0]
    r = jnp.where(r >= 0, r, a * r)
    r = conv(r, p["w2"], p["b2"])
    r = bn(r, p["g2"], p["beta2"])
    out = x + r
    return jnp.transpose(out, (0, 3, 1, 2))


if __name__ == "__main__":
    key = jax.random.PRNGKey(0)
    kx, kp = jax.random.split(key)

    N, C, H, W = 2, 4, 16, 16
    x = jax.random.normal(kx, (N, C, H, W), jnp.float32)   # NCHW like PyTorch
    params = init_params(kp, C)

    out = jax.block_until_ready(residual_block_pallas(x, params))
    ref = residual_block_ref(x, params)

    assert out.shape == (N, C, H, W)
    err = float(jnp.max(jnp.abs(out - ref)))
    assert jnp.allclose(out, ref, rtol=1e-3, atol=1e-3), err

    print("KERNEL_OK")
</pallas_src>

<mosaic_0001>
module attributes {stable_mosaic.version = 11 : i64} {
  func.func @_residual_block_kernel(%arg0: memref<2x16x64xf32, #tpu.memory_space<vmem>>, %arg1: memref<384x64xf32, #tpu.memory_space<vmem>>, %arg2: memref<1x64xf32, #tpu.memory_space<vmem>>, %arg3: memref<1x4xf32, #tpu.memory_space<vmem>>, %arg4: memref<1x4xf32, #tpu.memory_space<vmem>>, %arg5: memref<384x64xf32, #tpu.memory_space<vmem>>, %arg6: memref<1x64xf32, #tpu.memory_space<vmem>>, %arg7: memref<1x4xf32, #tpu.memory_space<vmem>>, %arg8: memref<1x4xf32, #tpu.memory_space<vmem>>, %arg9: memref<64x4xf32, #tpu.memory_space<vmem>>, %arg10: memref<4x64xf32, #tpu.memory_space<vmem>>, %arg11: memref<1xf32, #tpu.memory_space<smem>>, %arg12: memref<2x16x64xf32, #tpu.memory_space<vmem>>, %arg13: memref<2x16x384xf32, #tpu.memory_space<vmem>>) attributes {dimension_semantics = [], scalar_prefetch = 0 : i64, scratch_operands = 1 : i64, tpu.core_type = #tpu.core_type<tc>} {
    %cst = arith.constant 0.000000e+00 : f32
    %0 = vector.broadcast %cst : f32 to vector<2x16x384xf32>
    %c0 = arith.constant 0 : index
    %c0_0 = arith.constant 0 : index
    %c0_1 = arith.constant 0 : index
    %1 = vector.load %arg13[%c0, %c0_0, %c0_1] : memref<2x16x384xf32, #tpu.memory_space<vmem>>, vector<2x16x384xf32>
    tpu.vector_store %arg13[%c0, %c0_0, %c0_1], %0 {strides = array<i32>} : memref<2x16x384xf32, #tpu.memory_space<vmem>>, vector<2x16x384xf32>,
    %c0_2 = arith.constant 0 : index
    %c0_3 = arith.constant 0 : index
    %c0_4 = arith.constant 0 : index
    %2 = vector.load %arg0[%c0_2, %c0_3, %c0_4] : memref<2x16x64xf32, #tpu.memory_space<vmem>>, vector<2x16x64xf32>
    %3 = vector.extract_strided_slice %2 {offsets = [0, 0, 0], sizes = [2, 15, 64], strides = [1, 1, 1]} : vector<2x16x64xf32> to vector<2x15x64xf32>
    %c0_5 = arith.constant 0 : index
    %c1 = arith.constant 1 : index
    %c0_6 = arith.constant 0 : index
    %4 = vector.load %arg13[%c0_5, %c1, %c0_6] : memref<2x16x384xf32, #tpu.memory_space<vmem>>, vector<2x15x64xf32>
    tpu.vector_store %arg13[%c0_5, %c1, %c0_6], %3 {strides = array<i32>} : memref<2x16x384xf32, #tpu.memory_space<vmem>>, vector<2x15x64xf32>,
    %c0_7 = arith.constant 0 : index
    %c0_8 = arith.constant 0 : index
    %c128 = arith.constant 128 : index
    %5 = vector.load %arg13[%c0_7, %c0_8, %c128] : memref<2x16x384xf32, #tpu.memory_space<vmem>>, vector<2x16x64xf32>
    tpu.vector_store %arg13[%c0_7, %c0_8, %c128], %2 {strides = array<i32>} : memref<2x16x384xf32, #tpu.memory_space<vmem>>, vector<2x16x64xf32>,
    %6 = vector.extract_strided_slice %2 {offsets = [0, 1, 0], sizes = [2, 15, 64], strides = [1, 1, 1]} : vector<2x16x64xf32> to vector<2x15x64xf32>
    %c0_9 = arith.constant 0 : index
    %c0_10 = arith.constant 0 : index
    %c256 = arith.constant 256 : index
    %7 = vector.load %arg13[%c0_9, %c0_10, %c256] : memref<2x16x384xf32, #tpu.memory_space<vmem>>, vector<2x15x64xf32>
    tpu.vector_store %arg13[%c0_9, %c0_10, %c256], %6 {strides = array<i32>} : memref<2x16x384xf32, #tpu.memory_space<vmem>>, vector<2x15x64xf32>,
    %c0_11 = arith.constant 0 : index
    %c0_12 = arith.constant 0 : index
    %c0_13 = arith.constant 0 : index
    %8 = vector.load %arg13[%c0_11, %c0_12, %c0_13] : memref<2x16x384xf32, #tpu.memory_space<vmem>>, vector<2x16x384xf32>
    %9 = vector.shape_cast %8 : vector<2x16x384xf32> to vector<32x384xf32>
    %c0_14 = arith.constant 0 : index
    %c0_15 = arith.constant 0 : index
    %10 = vector.load %arg1[%c0_14, %c0_15] : memref<384x64xf32, #tpu.memory_space<vmem>>, vector<384x64xf32>
    %cst_16 = arith.constant dense<0.000000e+00> : vector<32x64xf32>
    %11 = tpu.matmul %9, %10, %cst_16 {dimension_numbers = #tpu.dot_dimension_numbers<[1], [0], [0], [1], [0, 0, 1, 1], [], []>} : vector<32x384xf32>, vector<384x64xf32>, vector<32x64xf32> -> vector<32x64xf32>
    %c0_17 = arith.constant 0 : index
    %c0_18 = arith.constant 0 : index
    %12 = vector.load %arg2[%c0_17, %c0_18] : memref<1x64xf32, #tpu.memory_space<vmem>>, vector<1x64xf32>
    %13 = vector.broadcast %12 : vector<1x64xf32> to vector<32x64xf32>
    %14 = arith.addf %11, %13 : vector<32x64xf32>
    %cst_19 = arith.constant dense<0.000000e+00> : vector<64xf32>
    %15 = vector.multi_reduction <add>, %14, %cst_19 [0] : vector<32x64xf32> to vector<64xf32>
    %16 = vector.shape_cast %15 : vector<64xf32> to vector<1x64xf32>
    %c0_20 = arith.constant 0 : index
    %c0_21 = arith.constant 0 : index
    %17 = vector.load %arg9[%c0_20, %c0_21] : memref<64x4xf32, #tpu.memory_space<vmem>>, vector<64x4xf32>
    %cst_22 = arith.constant dense<0.000000e+00> : vector<1x4xf32>
    %18 = tpu.matmul %16, %17, %cst_22 {dimension_numbers = #tpu.dot_dimension_numbers<[1], [0], [0], [1], [0, 0, 1, 1], [], []>} : vector<1x64xf32>, vector<64x4xf32>, vector<1x4xf32> -> vector<1x4xf32>
    %19 = arith.mulf %14, %14 : vector<32x64xf32>
    %cst_23 = arith.constant dense<0.000000e+00> : vector<64xf32>
    %20 = vector.multi_reduction <add>, %19, %cst_23 [0] : vector<32x64xf32> to vector<64xf32>
    %21 = vector.shape_cast %20 : vector<64xf32> to vector<1x64xf32>
    %c0_24 = arith.constant 0 : index
    %c0_25 = arith.constant 0 : index
    %22 = vector.load %arg9[%c0_24, %c0_25] : memref<64x4xf32, #tpu.memory_space<vmem>>, vector<64x4xf32>
    %cst_26 = arith.constant dense<0.000000e+00> : vector<1x4xf32>
    %23 = tpu.matmul %21, %22, %cst_26 {dimension_numbers = #tpu.dot_dimension_numbers<[1], [0], [0], [1], [0, 0, 1, 1], [], []>} : vector<1x64xf32>, vector<64x4xf32>, vector<1x4xf32> -> vector<1x4xf32>
    %cst_27 = arith.constant 0.001953125 : f32
    %24 = vector.broadcast %cst_27 : f32 to vector<1x4xf32>
    %25 = arith.mulf %18, %24 : vector<1x4xf32>
    %cst_28 = arith.constant 0.001953125 : f32
    %26 = vector.broadcast %cst_28 : f32 to vector<1x4xf32>
    %27 = arith.mulf %23, %26 : vector<1x4xf32>
    %28 = arith.mulf %25, %25 : vector<1x4xf32>
    %29 = arith.subf %27, %28 : vector<1x4xf32>
    %c0_29 = arith.constant 0 : index
    %c0_30 = arith.constant 0 : index
    %30 = vector.load %arg3[%c0_29, %c0_30] : memref<1x4xf32, #tpu.memory_space<vmem>>, vector<1x4xf32>
    %cst_31 = arith.constant 9.99999974E-6 : f32
    %31 = vector.broadcast %cst_31 : f32 to vector<1x4xf32>
    %32 = arith.addf %29, %31 : vector<1x4xf32>
    %33 = math.rsqrt %32 : vector<1x4xf32>
    %34 = arith.mulf %30, %33 : vector<1x4xf32>
    %c0_32 = arith.constant 0 : index
    %c0_33 = arith.constant 0 : index
    %35 = vector.load %arg4[%c0_32, %c0_33] : memref<1x4xf32, #tpu.memory_space<vmem>>, vector<1x4xf32>
    %36 = arith.mulf %25, %34 : vector<1x4xf32>
    %37 = arith.subf %35, %36 : vector<1x4xf32>
    %c0_34 = arith.constant 0 : index
    %c0_35 = arith.constant 0 : index
    %38 = vector.load %arg10[%c0_34, %c0_35] : memref<4x64xf32, #tpu.memory_space<vmem>>, vector<4x64xf32>
    %cst_36 = arith.constant dense<0.000000e+00> : vector<1x64xf32>
    %39 = tpu.matmul %34, %38, %cst_36 {dimension_numbers = #tpu.dot_dimension_numbers<[1], [0], [0], [1], [0, 0, 1, 1], [], []>} : vector<1x4xf32>, vector<4x64xf32>, vector<1x64xf32> -> vector<1x64xf32>
    %c0_37 = arith.constant 0 : index
    %c0_38 = arith.constant 0 : index
    %40 = vector.load %arg10[%c0_37, %c0_38] : memref<4x64xf32, #tpu.memory_space<vmem>>, vector<4x64xf32>
    %cst_39 = arith.constant dense<0.000000e+00> : vector<1x64xf32>
    %41 = tpu.matmul %37, %40, %cst_39 {dimension_numbers = #tpu.dot_dimension_numbers<[1], [0], [0], [1], [0, 0, 1, 1], [], []>} : vector<1x4xf32>, vector<4x64xf32>, vector<1x64xf32> -> vector<1x64xf32>
    %42 = vector.broadcast %39 : vector<1x64xf32> to vector<32x64xf32>
    %43 = arith.mulf %14, %42 : vector<32x64xf32>
    %44 = vector.broadcast %41 : vector<1x64xf32> to vector<32x64xf32>
    %45 = arith.addf %43, %44 : vector<32x64xf32>
    %c0_40 = arith.constant 0 : index
    %46 = memref.load %arg11[%c0_40] : memref<1xf32, #tpu.memory_space<smem>>
    %cst_41 = arith.constant 0.000000e+00 : f32
    %47 = vector.broadcast %cst_41 : f32 to vector<32x64xf32>
    %48 = arith.cmpf oge, %45, %47 : vector<32x64xf32>
    %49 = vector.broadcast %46 : f32 to vector<32x64xf32>
    %50 = arith.mulf %49, %45 : vector<32x64xf32>
    %51 = arith.select %48, %45, %50 : vector<32x64xi1>, vector<32x64xf32>
    %52 = vector.shape_cast %51 : vector<32x64xf32> to vector<2x16x64xf32>
    %53 = vector.extract_strided_slice %52 {offsets = [0, 0, 0], sizes = [2, 15, 64], strides = [1, 1, 1]} : vector<2x16x64xf32> to vector<2x15x64xf32>
    %c0_42 = arith.constant 0 : index
    %c1_43 = arith.constant 1 : index
    %c0_44 = arith.constant 0 : index
    %54 = vector.load %arg13[%c0_42, %c1_43, %c0_44] : memref<2x16x384xf32, #tpu.memory_space<vmem>>, vector<2x15x64xf32>
    tpu.vector_store %arg13[%c0_42, %c1_43, %c0_44], %53 {strides = array<i32>} : memref<2x16x384xf32, #tpu.memory_space<vmem>>, vector<2x15x64xf32>,
    %c0_45 = arith.constant 0 : index
    %c0_46 = arith.constant 0 : index
    %c128_47 = arith.constant 128 : index
    %55 = vector.load %arg13[%c0_45, %c0_46, %c128_47] : memref<2x16x384xf32, #tpu.memory_space<vmem>>, vector<2x16x64xf32>
    tpu.vector_store %arg13[%c0_45, %c0_46, %c128_47], %52 {strides = array<i32>} : memref<2x16x384xf32, #tpu.memory_space<vmem>>, vector<2x16x64xf32>,
    %56 = vector.extract_strided_slice %52 {offsets = [0, 1, 0], sizes = [2, 15, 64], strides = [1, 1, 1]} : vector<2x16x64xf32> to vector<2x15x64xf32>
    %c0_48 = arith.constant 0 : index
    %c0_49 = arith.constant 0 : index
    %c256_50 = arith.constant 256 : index
    %57 = vector.load %arg13[%c0_48, %c0_49, %c256_50] : memref<2x16x384xf32, #tpu.memory_space<vmem>>, vector<2x15x64xf32>
    tpu.vector_store %arg13[%c0_48, %c0_49, %c256_50], %56 {strides = array<i32>} : memref<2x16x384xf32, #tpu.memory_space<vmem>>, vector<2x15x64xf32>,
    %c0_51 = arith.constant 0 : index
    %c0_52 = arith.constant 0 : index
    %c0_53 = arith.constant 0 : index
    %58 = vector.load %arg13[%c0_51, %c0_52, %c0_53] : memref<2x16x384xf32, #tpu.memory_space<vmem>>, vector<2x16x384xf32>
    %59 = vector.shape_cast %58 : vector<2x16x384xf32> to vector<32x384xf32>
    %c0_54 = arith.constant 0 : index
    %c0_55 = arith.constant 0 : index
    %60 = vector.load %arg5[%c0_54, %c0_55] : memref<384x64xf32, #tpu.memory_space<vmem>>, vector<384x64xf32>
    %cst_56 = arith.constant dense<0.000000e+00> : vector<32x64xf32>
    %61 = tpu.matmul %59, %60, %cst_56 {dimension_numbers = #tpu.dot_dimension_numbers<[1], [0], [0], [1], [0, 0, 1, 1], [], []>} : vector<32x384xf32>, vector<384x64xf32>, vector<32x64xf32> -> vector<32x64xf32>
    %c0_57 = arith.constant 0 : index
    %c0_58 = arith.constant 0 : index
    %62 = vector.load %arg6[%c0_57, %c0_58] : memref<1x64xf32, #tpu.memory_space<vmem>>, vector<1x64xf32>
    %63 = vector.broadcast %62 : vector<1x64xf32> to vector<32x64xf32>
    %64 = arith.addf %61, %63 : vector<32x64xf32>
    %cst_59 = arith.constant dense<0.000000e+00> : vector<64xf32>
    %65 = vector.multi_reduction <add>, %64, %cst_59 [0] : vector<32x64xf32> to vector<64xf32>
    %66 = vector.shape_cast %65 : vector<64xf32> to vector<1x64xf32>
    %c0_60 = arith.constant 0 : index
    %c0_61 = arith.constant 0 : index
    %67 = vector.load %arg9[%c0_60, %c0_61] : memref<64x4xf32, #tpu.memory_space<vmem>>, vector<64x4xf32>
    %cst_62 = arith.constant dense<0.000000e+00> : vector<1x4xf32>
    %68 = tpu.matmul %66, %67, %cst_62 {dimension_numbers = #tpu.dot_dimension_numbers<[1], [0], [0], [1], [0, 0, 1, 1], [], []>} : vector<1x64xf32>, vector<64x4xf32>, vector<1x4xf32> -> vector<1x4xf32>
    %69 = arith.mulf %64, %64 : vector<32x64xf32>
    %cst_63 = arith.constant dense<0.000000e+00> : vector<64xf32>
    %70 = vector.multi_reduction <add>, %69, %cst_63 [0] : vector<32x64xf32> to vector<64xf32>
    %71 = vector.shape_cast %70 : vector<64xf32> to vector<1x64xf32>
    %c0_64 = arith.constant 0 : index
    %c0_65 = arith.constant 0 : index
    %72 = vector.load %arg9[%c0_64, %c0_65] : memref<64x4xf32, #tpu.memory_space<vmem>>, vector<64x4xf32>
    %cst_66 = arith.constant dense<0.000000e+00> : vector<1x4xf32>
    %73 = tpu.matmul %71, %72, %cst_66 {dimension_numbers = #tpu.dot_dimension_numbers<[1], [0], [0], [1], [0, 0, 1, 1], [], []>} : vector<1x64xf32>, vector<64x4xf32>, vector<1x4xf32> -> vector<1x4xf32>
    %cst_67 = arith.constant 0.001953125 : f32
    %74 = vector.broadcast %cst_67 : f32 to vector<1x4xf32>
    %75 = arith.mulf %68, %74 : vector<1x4xf32>
    %cst_68 = arith.constant 0.001953125 : f32
    %76 = vector.broadcast %cst_68 : f32 to vector<1x4xf32>
    %77 = arith.mulf %73, %76 : vector<1x4xf32>
    %78 = arith.mulf %75, %75 : vector<1x4xf32>
    %79 = arith.subf %77, %78 : vector<1x4xf32>
    %c0_69 = arith.constant 0 : index
    %c0_70 = arith.constant 0 : index
    %80 = vector.load %arg7[%c0_69, %c0_70] : memref<1x4xf32, #tpu.memory_space<vmem>>, vector<1x4xf32>
    %cst_71 = arith.constant 9.99999974E-6 : f32
    %81 = vector.broadcast %cst_71 : f32 to vector<1x4xf32>
    %82 = arith.addf %79, %81 : vector<1x4xf32>
    %83 = math.rsqrt %82 : vector<1x4xf32>
    %84 = arith.mulf %80, %83 : vector<1x4xf32>
    %c0_72 = arith.constant 0 : index
    %c0_73 = arith.constant 0 : index
    %85 = vector.load %arg8[%c0_72, %c0_73] : memref<1x4xf32, #tpu.memory_space<vmem>>, vector<1x4xf32>
    %86 = arith.mulf %75, %84 : vector<1x4xf32>
    %87 = arith.subf %85, %86 : vector<1x4xf32>
    %c0_74 = arith.constant 0 : index
    %c0_75 = arith.constant 0 : index
    %88 = vector.load %arg10[%c0_74, %c0_75] : memref<4x64xf32, #tpu.memory_space<vmem>>, vector<4x64xf32>
    %cst_76 = arith.constant dense<0.000000e+00> : vector<1x64xf32>
    %89 = tpu.matmul %84, %88, %cst_76 {dimension_numbers = #tpu.dot_dimension_numbers<[1], [0], [0], [1], [0, 0, 1, 1], [], []>} : vector<1x4xf32>, vector<4x64xf32>, vector<1x64xf32> -> vector<1x64xf32>
    %c0_77 = arith.constant 0 : index
    %c0_78 = arith.constant 0 : index
    %90 = vector.load %arg10[%c0_77, %c0_78] : memref<4x64xf32, #tpu.memory_space<vmem>>, vector<4x64xf32>
    %cst_79 = arith.constant dense<0.000000e+00> : vector<1x64xf32>
    %91 = tpu.matmul %87, %90, %cst_79 {dimension_numbers = #tpu.dot_dimension_numbers<[1], [0], [0], [1], [0, 0, 1, 1], [], []>} : vector<1x4xf32>, vector<4x64xf32>, vector<1x64xf32> -> vector<1x64xf32>
    %92 = vector.broadcast %89 : vector<1x64xf32> to vector<32x64xf32>
    %93 = arith.mulf %64, %92 : vector<32x64xf32>
    %94 = vector.broadcast %91 : vector<1x64xf32> to vector<32x64xf32>
    %95 = arith.addf %93, %94 : vector<32x64xf32>
    %96 = vector.shape_cast %95 : vector<32x64xf32> to vector<2x16x64xf32>
    %97 = arith.addf %2, %96 : vector<2x16x64xf32>
    %c0_80 = arith.constant 0 : index
    %c0_81 = arith.constant 0 : index
    %c0_82 = arith.constant 0 : index
    %98 = vector.load %arg12[%c0_80, %c0_81, %c0_82] : memref<2x16x64xf32, #tpu.memory_space<vmem>>, vector<2x16x64xf32>
    tpu.vector_store %arg12[%c0_80, %c0_81, %c0_82], %97 {strides = array<i32>} : memref<2x16x64xf32, #tpu.memory_space<vmem>>, vector<2x16x64xf32>,
    return
  }
}

</mosaic_0001>

<bundles_post_ra>
// kernel: tile.13
= control target key start
LH: loop header
LB: loop body
LE: loop exit
PB: predicated region body
PF: predicated region fallthrough
CT: control target
= control target key end

     0   :  { %s28_s0 = inlined_call_operand.vmem [shape: f32[4], index: 0, kind: input, shape index: {}]   ;;  %s29_s1 = inlined_call_operand.vmem [shape: f32[16,4], index: 1, kind: output, shape index: {}]  }
   0x1   :  { %v4_v0 = vld [vmem:[%s28_s0] ss:$0 sm:$0xff] }
   0x2   :  { %5 = vst [vmem:[%s29_s1] sm:$0xff] %v4_v0 }
   0x3   :  { %8 = vst [vmem:[%s29_s1 + $0x8] sm:$0xff] %v4_v0 }

// kernel: tile.14
= control target key start
LH: loop header
LB: loop body
LE: loop exit
PB: predicated region body
PF: predicated region fallthrough
CT: control target
= control target key end

     0   :  { %s131_s10 = smov 60   ;;  %s132_s11 = smov 52   ;;  %vm3_vm0 = vcmask 31744   ;;  %vm9_vm1 = vcmask 523744   ;;  %vm15_vm2 = vcmask 490944   ;;  %vm21_vm3 = vcmask 458144   ;;  %s207_s0 = inlined_call_operand.vmem [shape: f32[16,4], index: 0, kind: input, shape index: {}]   ;;  %s208_s1 = inlined_call_operand.vmem [shape: f32[1,64], index: 1, kind: output, shape index: {}]  }
   0x1   :  { %v101_v0 = vld [vmem:[%s207_s0 + $0xf] sm:$0x1]   ;;  %v103_v1 = vld [vmem:[%s207_s0 + $0xd] sm:$0x1]   ;;  %v105_v2 = vld [vmem:[%s207_s0 + $0xb] sm:$0x1]  }
   0x2   :  { %7 = vrot.lane.b32.xlu0 %v101_v0, %s131_s10  ;;  %19 = vrot.lane.b32.xlu1 %v103_v1, %s132_s11  ;;  %s133_s14 = smov 44   ;;  %v102_v3 = vld [vmem:[%s207_s0 + $0xe] sm:$0x1]   ;;  %v104_v4 = vld [vmem:[%s207_s0 + $0xc] sm:$0x1]   ;;  %s134_s19 = smov 56  }
   0x3   :  { %31 = vrot.lane.b32.xlu2 %v105_v2, %s133_s14  ;;  %s135_s20 = smov 48   ;;  %v106_v5 = vld [vmem:[%s207_s0 + $0xa] sm:$0x1]   ;;  %s136_s23 = smov 40   ;;  %v107_v6 = vld [vmem:[%s207_s0 + $0x9] sm:$0x1]  }
   0x4   :  { %v108_v7 = vld [vmem:[%s207_s0 + $0x8] sm:$0x1]   ;;  %s137_s28 = smov 36   ;;  %s138_s29 = smov 32   ;;  %v109_v8 = vld [vmem:[%s207_s0 + $0x7] sm:$0x1]  }
   0x5   :  { %s139_s3 = smov 28   ;;  %v110_v9 = vld [vmem:[%s207_s0 + $0x6] sm:$0x1]   ;;  %v111_v10 = vld [vmem:[%s207_s0 + $0x5] sm:$0x1]   ;;  %s140_s8 = smov 24  }
   0x6   :  { %s141_s9 = smov 20   ;;  %v112_v11 = vld [vmem:[%s207_s0 + $0x4] sm:$0x1]   ;;  %s142_s12 = smov 16   ;;  %v113_v12 = vld [vmem:[%s207_s0 + $0x3] sm:$0x1]  }
   0x7   :  { %v114_v13 = vld [vmem:[%s207_s0 + $0x2] sm:$0x1]   ;;  %s143_s17 = smov 12   ;;  %s144_s18 = smov 8   ;;  %v115_v14 = vld [vmem:[%s207_s0 + $0x1] sm:$0x1]  }
   0x8   :  { %s145_s21 = smov 4   ;;  %v2_v15 = vld [vmem:[%s207_s0] sm:$0x1]   ;;  %vm27_vm4 = vcmask 425344   ;;  %vm33_vm5 = vcmask 392544   ;;  %vm39_vm6 = vcmask 359744  }
   0x9   :  { %4 = vst.msk [vmem:[#allocation0] sm:$0x1] %vm3_vm0, %v2_v15   ;;  %vm45_vm7 = vcmask 326944   ;;  %vm51_vm8 = vcmask 294144   ;;  %vm57_vm9 = vcmask 261344   ;;  %vm63_vm10 = vcmask 228544  }
   0xa   :  { %13 = vrot.lane.b32.xlu0 %v102_v3, %s134_s19  ;;  %25 = vrot.lane.b32.xlu1 %v104_v4, %s135_s20  ;;  %vm69_vm11 = vcmask 195744   ;;  %vm75_vm12 = vcmask 162944   ;;  %vm81_vm13 = vcmask 130144   ;;  %vm87_vm14 = vcmask 97344  }
   0xb   :  { %37 = vrot.lane.b32.xlu2 %v106_v5, %s136_s23  ;;  %vm93_vm15 = vcmask 64544  }
  0x12   :  { %43 = vrot.lane.b32.xlu0 %v107_v6, %s137_s28  ;;  %49 = vrot.lane.b32.xlu1 %v108_v7, %s138_s29 }
  0x13   :  { %55 = vrot.lane.b32.xlu2 %v109_v8, %s139_s3 }
  0x1a   :  { %61 = vrot.lane.b32.xlu0 %v110_v9, %s140_s8  ;;  %67 = vrot.lane.b32.xlu1 %v111_v10, %s141_s9 }
  0x1b   :  { %73 = vrot.lane.b32.xlu2 %v112_v11, %s142_s12 }
  0x22   :  { %79 = vrot.lane.b32.xlu0 %v113_v12, %s143_s17  ;;  %85 = vrot.lane.b32.xlu1 %v114_v13, %s144_s18 }
  0x23   :  { %91 = vrot.lane.b32.xlu2 %v115_v14, %s145_s21 }
  0x5d   :  { %v32_v16 = vpop.permute.xlu2 %31  }
  0x65   :  { %v38_v17 = vpop.permute.xlu2 %37  }
  0x6d   :  { %v56_v18 = vpop.permute.xlu2 %55  }
  0x74   :  { %v8_v19 = vpop.permute.xlu0 %7   ;;  %v20_v20 = vpop.permute.xlu1 %19  }
  0x75   :  { %10 = vst.msk [vmem:[#allocation0] sm:$0x1] %vm9_vm1, %v8_v19   ;;  %v74_v21 = vpop.permute.xlu2 %73  }
  0x7c   :  { %v14_v22 = vpop.permute.xlu0 %13   ;;  %v26_v23 = vpop.permute.xlu1 %25  }
  0x7d   :  { %16 = vst.msk [vmem:[#allocation0] sm:$0x1] %vm15_vm2, %v14_v22   ;;  %v92_v24 = vpop.permute.xlu2 %91  }
  0x7e   :  { %22 = vst.msk [vmem:[#allocation0] sm:$0x1] %vm21_vm3, %v20_v20  }
  0x7f   :  { %28 = vst.msk [vmem:[#allocation0] sm:$0x1] %vm27_vm4, %v26_v23  }
  0x80   :  { %34 = vst.msk [vmem:[#allocation0] sm:$0x1] %vm33_vm5, %v32_v16  }
  0x81   :  { %40 = vst.msk [vmem:[#allocation0] sm:$0x1] %vm39_vm6, %v38_v17  }
  0x84   :  { %v44_v25 = vpop.permute.xlu0 %43   ;;  %v50_v26 = vpop.permute.xlu1 %49  }
  0x85   :  { %46 = vst.msk [vmem:[#allocation0] sm:$0x1] %vm45_vm7, %v44_v25  }
  0x86   :  { %52 = vst.msk [vmem:[#allocation0] sm:$0x1] %vm51_vm8, %v50_v26  }
  0x87   :  { %58 = vst.msk [vmem:[#allocation0] sm:$0x1] %vm57_vm9, %v56_v18  }
  0x8c   :  { %v62_v27 = vpop.permute.xlu0 %61   ;;  %v68_v28 = vpop.permute.xlu1 %67  }
  0x8d   :  { %64 = vst.msk [vmem:[#allocation0] sm:$0x1] %vm63_vm10, %v62_v27  }
  0x8e   :  { %70 = vst.msk [vmem:[#allocation0] sm:$0x1] %vm69_vm11, %v68_v28  }
  0x8f   :  { %76 = vst.msk [vmem:[#allocation0] sm:$0x1] %vm75_vm12, %v74_v21  }
  0x94   :  { %v80_v29 = vpop.permute.xlu0 %79   ;;  %v86_v30 = vpop.permute.xlu1 %85  }
  0x95   :  { %82 = vst.msk [vmem:[#allocation0] sm:$0x1] %vm81_vm13, %v80_v29  }
  0x96   :  { %88 = vst.msk [vmem:[#allocation0] sm:$0x1] %vm87_vm14, %v86_v30  }
  0x97   :  { %94 = vst.msk [vmem:[#allocation0] sm:$0x1] %vm93_vm15, %v92_v24  }
  0x9e   :  { %v97_v31 = vld [vmem:[#allocation0] sm:$0x1] }
  0x9f   :  { %100 = vst [vmem:[%s208_s1] sm:$0x1] %v97_v31 }

// kernel: residual_block_pallas.1
= control target key start
LH: loop header
LB: loop body
LE: loop exit
PB: predicated region body
PF: predicated region fallthrough
CT: control target
= control target key end

     0   :  { %v812_v3 = vmov 0.0   ;;  %vm75_vm0 = vcmask 523264   ;;  %vm83_vm1 = vcmask 1046528   ;;  %vm73_vm2 = vcmask 523265   ;;  %s1419_s1 = inlined_call_operand.vmem [shape: f32[384,64], index: 1, kind: input, shape index: {}]   ;;  %s1420_s0 = inlined_call_operand.vmem [shape: f32[2,16,64], index: 0, kind: input, shape index: {}, may-alias: {0,12}]   ;;  %s1421_s2 = inlined_call_operand.vmem [shape: f32[1,64], index: 2, kind: input, shape index: {}]   ;;  %s1422_s9 = inlined_call_operand.vmem [shape: f32[64,4], index: 9, kind: input, shape index: {}]   ;;  %s1423_s10 = inlined_call_operand.vmem [shape: f32[4,64], index: 10, kind: input, shape index: {}]   ;;  %s1424_s5 = inlined_call_operand.vmem [shape: f32[384,64], index: 5, kind: input, shape index: {}]   ;;  %s1425_s3 = inlined_call_operand.vmem [shape: f32[1,4], index: 3, kind: input, shape index: {}]   ;;  %s1426_s4 = inlined_call_operand.vmem [shape: f32[1,4], index: 4, kind: input, shape index: {}]   ;;  %s1427_s11 = inlined_call_operand.<no memory space> [shape: f32[1], index: 11, kind: input, shape index: {}]   ;;  %s1428_s6 = inlined_call_operand.vmem [shape: f32[1,64], index: 6, kind: input, shape index: {}]   ;;  %s1429_s7 = inlined_call_operand.vmem [shape: f32[1,4], index: 7, kind: input, shape index: {}]   ;;  %s1430_s8 = inlined_call_operand.vmem [shape: f32[1,4], index: 8, kind: input, shape index: {}]   ;;  %s1431_s12 = inlined_call_operand.vmem [shape: f32[2,16,64], index: 12, kind: output, shape index: {}, may-alias: {0,12}]  }
   0x1   :  { %v158_v0 = vld [vmem:[%s1419_s1 + $0x178] sm:$0xff]  ;;  %v157_v2 = vld [vmem:[%s1419_s1 + $0x170] sm:$0xff]  ;;  %44 = vst [vmem:[#allocation2 + $0x10] sm:$0xff] %v812_v3  ;;  %v156_v6 = vld [vmem:[%s1419_s1 + $0x168] sm:$0xff]  ;;  %vm95_vm3 = vcmask 522240   ;;  %vm62_vm4 = vcmask 1040384  }
   0x2   :  { %v126_v1 = vld [vmem:[%s1419_s1 + $0x78] sm:$0xff]  ;;  %221 = vmatpush.msra.mxu2 %v158_v0  ;;  %v125_v4 = vld [vmem:[%s1419_s1 + $0x70] sm:$0xff]  ;;  %42 = vst [vmem:[#allocation2] sm:$0xff] %v812_v3  ;;  %v124_v7 = vld [vmem:[%s1419_s1 + $0x68] sm:$0xff]  ;;  %vm359_vm5 = vcmask 1043456   ;;  %vm355_vm9 = vcmask 31744  }
   0x3   :  { %163 = vmatpush.msra.mxu0 %v126_v1  ;;  %v142_v5 = vld [vmem:[%s1419_s1 + $0xf8] sm:$0xff]  ;;  %v141_v8 = vld [vmem:[%s1419_s1 + $0xf0] sm:$0xff]  ;;  %43 = vst [vmem:[#allocation2 + $0x8] sm:$0xff] %v812_v3  ;;  %v140_v9 = vld [vmem:[%s1419_s1 + $0xe8] sm:$0xff] }
   0x4   :  { %192 = vmatpush.msra.mxu1 %v142_v5  ;;  %222 = vmatpush.msra.mxu2 %v157_v2  ;;  %45 = vst [vmem:[#allocation2 + $0x18] sm:$0xff] %v812_v3  ;;  %v155_v10 = vld [vmem:[%s1419_s1 + $0x160] sm:$0xff]  ;;  %v154_v13 = vld [vmem:[%s1419_s1 + $0x158] sm:$0xff]  ;;  %v153_v16 = vld [vmem:[%s1419_s1 + $0x150] sm:$0xff] }
   0x5   :  { %164 = vmatpush.msra.mxu0 %v125_v4  ;;  %v123_v11 = vld [vmem:[%s1419_s1 + $0x60] sm:$0xff]  ;;  %46 = vst [vmem:[#allocation2 + $0x20] sm:$0xff] %v812_v3  ;;  %v122_v14 = vld [vmem:[%s1419_s1 + $0x58] sm:$0xff]  ;;  %v121_v17 = vld [vmem:[%s1419_s1 + $0x50] sm:$0xff] }
   0x6   :  { %193 = vmatpush.msra.mxu1 %v141_v8  ;;  %223 = vmatpush.msra.mxu2 %v156_v6  ;;  %v139_v12 = vld [vmem:[%s1419_s1 + $0xe0] sm:$0xff]  ;;  %47 = vst [vmem:[#allocation2 + $0x28] sm:$0xff] %v812_v3  ;;  %v138_v15 = vld [vmem:[%s1419_s1 + $0xd8] sm:$0xff]  ;;  %v137_v18 = vld [vmem:[%s1419_s1 + $0xd0] sm:$0xff] }
   0x7   :  { %165 = vmatpush.msra.mxu0 %v124_v7  ;;  %48 = vst [vmem:[#allocation2 + $0x30] sm:$0xff] %v812_v3  ;;  %v152_v19 = vld [vmem:[%s1419_s1 + $0x148] sm:$0xff]  ;;  %v151_v22 = vld [vmem:[%s1419_s1 + $0x140] sm:$0xff]  ;;  %v150_v25 = vld [vmem:[%s1419_s1 + $0x138] sm:$0xff] }
   0x8   :  { %194 = vmatpush.msra.mxu1 %v140_v9  ;;  %224 = vmatpush.msra.mxu2 %v155_v10  ;;  %49 = vst [vmem:[#allocation2 + $0x38] sm:$0xff] %v812_v3  ;;  %v120_v20 = vld [vmem:[%s1419_s1 + $0x48] sm:$0xff]  ;;  %v119_v23 = vld [vmem:[%s1419_s1 + $0x40] sm:$0xff]  ;;  %v118_v26 = vld [vmem:[%s1419_s1 + $0x38] sm:$0xff] }
   0x9   :  { %166 = vmatpush.msra.mxu0 %v123_v11  ;;  %50 = vst [vmem:[#allocation2 + $0x40] sm:$0xff] %v812_v3  ;;  %v136_v21 = vld [vmem:[%s1419_s1 + $0xc8] sm:$0xff]  ;;  %v135_v24 = vld [vmem:[%s1419_s1 + $0xc0] sm:$0xff]  ;;  %v149_v27 = vld [vmem:[%s1419_s1 + $0x130] sm:$0xff] }
   0xa   :  { %195 = vmatpush.msra.mxu1 %v139_v12  ;;  %225 = vmatpush.msra.mxu2 %v154_v13  ;;  %51 = vst [vmem:[#allocation2 + $0x48] sm:$0xff] %v812_v3  ;;  %v134_v28 = vld [vmem:[%s1419_s1 + $0xb8] sm:$0xff]  ;;  %v965_v29 = vld [vmem:[%s1420_s0] sm:$0xff]  ;;  %v970_v30 = vld [vmem:[%s1420_s0 + $0x8] sm:$0xff] }
   0xb   :  { %167 = vmatpush.msra.mxu0 %v122_v14  ;;  %52 = vst [vmem:[#allocation2 + $0x50] sm:$0xff] %v812_v3  ;;  %v117_v31 = vld [vmem:[%s1419_s1 + $0x30] sm:$0xff]  ;;  %v84_v33 = vrot.slane %v965_v29, 1  ;;  %v85_v34 = vrot.slane %v970_v30, 1  ;;  %v63_v35 = vrot.slane %v965_v29, 7  ;;  %v64_v36 = vrot.slane %v970_v30, 7 }
   0xc   :  { %196 = vmatpush.msra.mxu1 %v138_v15  ;;  %226 = vmatpush.msra.mxu2 %v153_v16  ;;  %53 = vst [vmem:[#allocation2 + $0x58] sm:$0xff] %v812_v3  ;;  %v133_v32 = vld [vmem:[%s1419_s1 + $0xb0] sm:$0xff]  ;;  %v994_v38 = vld [vmem:[%s1420_s0 + $0x18] sm:$0xff]  ;;  %v148_v39 = vld [vmem:[%s1419_s1 + $0x128] sm:$0xff] }
   0xd   :  { %168 = vmatpush.msra.mxu0 %v121_v17  ;;  %79 = vst.msk [vmem:[#allocation2 + $0x8] sm:$0xff] %vm75_vm0, %v965_v29  ;;  %v989_v37 = vld [vmem:[%s1420_s0 + $0x10] sm:$0xff]  ;;  %v116_v40 = vld [vmem:[%s1419_s1 + $0x28] sm:$0xff]  ;;  %v86_v41 = vsel %vm83_vm1, %v84_v33, %v85_v34  ;;  %v88_v43 = vrot.slane %v994_v38, 1  ;;  %v65_v45 = vsel %vm62_vm4, %v63_v35, %v64_v36  ;;  %v147_v46 = vld [vmem:[%s1419_s1 + $0x120] sm:$0xff]  ;;  %v67_v49 = vrot.slane %v994_v38, 7 }
   0xe   :  { %197 = vmatpush.msra.mxu1 %v137_v18  ;;  %227 = vmatpush.msra.mxu2 %v152_v19  ;;  %80 = vst.msk [vmem:[#allocation2 + $0x20] sm:$0xff] %vm75_vm0, %v970_v30  ;;  %v87_v42 = vrot.slane %v989_v37, 1  ;;  %v132_v44 = vld [vmem:[%s1419_s1 + $0xa8] sm:$0xff]  ;;  %v115_v47 = vld [vmem:[%s1419_s1 + $0x20] sm:$0xff]  ;;  %v146_v51 = vld [vmem:[%s1419_s1 + $0x118] sm:$0xff]  ;;  %v66_v53 = vrot.slane %v989_v37, 7 }
   0xf   :  { %169 = vmatpush.msra.mxu0 %v120_v20  ;;  %74 = vst.msk [vmem:[#allocation2] sm:$0xfe] %vm73_vm2, %v63_v35  ;;  %v131_v50 = vld [vmem:[%s1419_s1 + $0xa0] sm:$0xff]  ;;  %v114_v52 = vld [vmem:[%s1419_s1 + $0x18] sm:$0xff]  ;;  %v145_v55 = vld [vmem:[%s1419_s1 + $0x110] sm:$0xff] }
  0x10   :  { %198 = vmatpush.msra.mxu1 %v136_v21  ;;  %228 = vmatpush.msra.mxu2 %v151_v22  ;;  %94 = vst.msk [vmem:[#allocation2 + $0x10] sm:$0xff] %vm75_vm0, %v86_v41  ;;  %v89_v48 = vsel %vm83_vm1, %v87_v42, %v88_v43  ;;  %v130_v54 = vld [vmem:[%s1419_s1 + $0x98] sm:$0xff]  ;;  %v113_v56 = vld [vmem:[%s1419_s1 + $0x10] sm:$0xff]  ;;  %v68_v57 = vsel %vm62_vm4, %v66_v53, %v67_v49  ;;  %v144_v59 = vld [vmem:[%s1419_s1 + $0x108] sm:$0xff] }
  0x11   :  { %170 = vmatpush.msra.mxu0 %v119_v23  ;;  %96 = vst.msk [vmem:[#allocation2 + $0x28] sm:$0x7f] %vm95_vm3, %v85_v34  ;;  %v129_v58 = vld [vmem:[%s1419_s1 + $0x90] sm:$0xff]  ;;  %v112_v60 = vld [vmem:[%s1419_s1 + $0x8] sm:$0xff]  ;;  %v143_v62 = vld [vmem:[%s1419_s1 + $0x100] sm:$0xff] }
  0x12   :  { %199 = vmatpush.msra.mxu1 %v135_v24  ;;  %229 = vmatpush.msra.mxu2 %v150_v25  ;;  %76 = vst.msk [vmem:[#allocation2 + $0x18] sm:$0xff] %vm75_vm0, %v65_v45  ;;  %v128_v61 = vld [vmem:[%s1419_s1 + $0x88] sm:$0xff]  ;;  %v111_v63 = vld [vmem:[%s1419_s1] sm:$0xff]  ;;  %v1073_v13 = vld [vmem:[%s1422_s9 + $0x38] sm:$0xff] }
  0x13   :  { %171 = vmatpush.msra.mxu0 %v118_v26  ;;  %97 = vst.msk [vmem:[#allocation2 + $0x40] sm:$0xff] %vm75_vm0, %v89_v48  ;;  %v127_v2 = vld [vmem:[%s1419_s1 + $0x80] sm:$0xff]  ;;  %282 = vmatpush.msra.mxu3 %v1073_v13  ;;  %v1079_v14 = vld [vmem:[%s1422_s9 + $0x30] sm:$0xff]  ;;  %v1085_v15 = vld [vmem:[%s1422_s9 + $0x28] sm:$0xff] }
  0x14   :  { %200 = vmatpush.msra.mxu1 %v134_v28  ;;  %230 = vmatpush.msra.mxu2 %v149_v27  ;;  %81 = vst.msk [vmem:[#allocation2 + $0x38] sm:$0xff] %vm75_vm0, %v989_v37  ;;  %v100_v3 = vld [vmem:[#allocation2 + $0x8] sm:$0xff]  ;;  %v1091_v16 = vld [vmem:[%s1422_s9 + $0x20] sm:$0xff]  ;;  %v1097_v18 = vld [vmem:[%s1422_s9 + $0x18] sm:$0xff] }
  0x15   :  { %172 = vmatpush.msra.mxu0 %v117_v31  ;;  %82 = vst.msk [vmem:[#allocation2 + $0x50] sm:$0xff] %vm75_vm0, %v994_v38  ;;  %v103_v6 = vld [vmem:[#allocation2 + $0x20] sm:$0xff]  ;;  %283 = vmatpush.msra.mxu3 %v1079_v14  ;;  %v1103_v20 = vld [vmem:[%s1422_s9 + $0x10] sm:$0xff]  ;;  %v1109_v21 = vld [vmem:[%s1422_s9 + $0x8] sm:$0xff] }
  0x16   :  { %201 = vmatpush.msra.mxu1 %v133_v32  ;;  %231 = vmatpush.msra.mxu2 %v148_v39  ;;  %98 = vst.msk [vmem:[#allocation2 + $0x58] sm:$0x7f] %vm95_vm3, %v88_v43  ;;  %v99_v1 = vld [vmem:[#allocation2] sm:$0xff] }
  0x17   :  { %173 = vmatpush.msra.mxu0 %v116_v40  ;;  %77 = vst.msk [vmem:[#allocation2 + $0x30] sm:$0xfe] %vm73_vm2, %v66_v53  ;;  %v101_v0 = vld [vmem:[#allocation2 + $0x10] sm:$0xff]  ;;  %284 = vmatpush.msra.mxu3 %v1085_v15  ;;  %v1115_v23 = vld [vmem:[%s1422_s9] sm:$0xff] }
  0x18   :  { %202 = vmatpush.msra.mxu1 %v132_v44  ;;  %232 = vmatpush.msra.mxu2 %v147_v46  ;;  %78 = vst.msk [vmem:[#allocation2 + $0x48] sm:$0xff] %vm75_vm0, %v68_v57  ;;  %v104_v4 = vld [vmem:[#allocation2 + $0x28] sm:$0xff]  ;;  %v806_v26 = vld [vmem:[%s1421_s2] ss:$0 sm:$0xff] }
  0x19   :  { %174 = vmatpush.msra.mxu0 %v115_v47  ;;  %v102_v5 = vld [vmem:[#allocation2 + $0x18] sm:$0xff]  ;;  %285 = vmatpush.msra.mxu3 %v1091_v16 }
  0x1a   :  { %203 = vmatpush.msra.mxu1 %v131_v50  ;;  %233 = vmatpush.msra.mxu2 %v146_v51  ;;  %v107_v7 = vld [vmem:[#allocation2 + $0x40] sm:$0xff] }
  0x1b   :  { %175 = vmatpush.msra.mxu0 %v114_v52  ;;  %v106_v9 = vld [vmem:[#allocation2 + $0x38] sm:$0xff]  ;;  %286 = vmatpush.msra.mxu3 %v1097_v18 }
  0x1c   :  { %204 = vmatpush.msra.mxu1 %v130_v54  ;;  %234 = vmatpush.msra.mxu2 %v145_v55  ;;  %v109_v12 = vld [vmem:[#allocation2 + $0x50] sm:$0xff] }
  0x1d   :  { %176 = vmatpush.msra.mxu0 %v113_v56  ;;  %v110_v10 = vld [vmem:[#allocation2 + $0x58] sm:$0xff]  ;;  %287 = vmatpush.msra.mxu3 %v1103_v20 }
  0x1e   :  { %205 = vmatpush.msra.mxu1 %v129_v58  ;;  %235 = vmatpush.msra.mxu2 %v144_v59  ;;  %v105_v8 = vld [vmem:[#allocation2 + $0x30] sm:$0xff] }
  0x1f   :  { %177 = vmatpush.msra.mxu0 %v112_v60  ;;  %v108_v11 = vld [vmem:[#allocation2 + $0x48] sm:$0xff]  ;;  %288 = vmatpush.msra.mxu3 %v1109_v21 }
  0x20   :  { %206 = vmatpush.msra.mxu1 %v128_v61  ;;  %236 = vmatpush.msra.mxu2 %v143_v62 }
  0x21   :  { %178 = vmatpush.msra.mxu0 %v111_v63  ;;  %237 = vmatmul.f32.vlgmr.msra.gmra.mxu2 %v101_v0 }
  0x22   :  { %179 = vmatmul.f32.vlgmr.msra.gmra.mxu0 %v99_v1  ;;  %207 = vmatpush.msra.mxu1 %v127_v2 }
  0x23   :  { %208 = vmatmul.f32.vlgmr.msra.gmra.mxu1 %v100_v3  ;;  %289 = vmatpush.msra.mxu3 %v1115_v23 }
  0x25   :  { %322 = vmatpush.msrb.mxu3 %v1073_v13 }
  0x27   :  { %323 = vmatpush.msrb.mxu3 %v1079_v14 }
  0x29   :  { %240 = vmatmul.f32.gmra.mxu2 %v104_v4  ;;  %324 = vmatpush.msrb.mxu3 %v1085_v15 }
  0x2a   :  { %182 = vmatmul.f32.gmra.mxu0 %v102_v5 }
  0x2b   :  { %211 = vmatmul.f32.gmra.mxu1 %v103_v6  ;;  %325 = vmatpush.msrb.mxu3 %v1091_v16 }
  0x2d   :  { %326 = vmatpush.msrb.mxu3 %v1097_v18 }
  0x2f   :  { %327 = vmatpush.msrb.mxu3 %v1103_v20 }
  0x31   :  { %243 = vmatmul.f32.gmra.mxu2 %v107_v7  ;;  %328 = vmatpush.msrb.mxu3 %v1109_v21 }
  0x32   :  { %185 = vmatmul.f32.gmra.mxu0 %v105_v8 }
  0x33   :  { %214 = vmatmul.f32.gmra.mxu1 %v106_v9  ;;  %329 = vmatpush.msrb.mxu3 %v1115_v23 }
  0x39   :  { %246 = vmatmul.f32.gmra.mxu2 %v110_v10 }
  0x3a   :  { %188 = vmatmul.f32.gmra.mxu0 %v108_v11 }
  0x3b   :  { %217 = vmatmul.f32.gmra.mxu1 %v109_v12 }
  0x9f   :  { %v180_v17 = vpop.f32.mrf.mxu0 }
  0xa0   :  { %v209_v19 = vpop.f32.mrf.mxu1  ;;  %v181_v31 = vadd.f32 %v806_v26, %v180_v17 }
  0xa2   :  { %v210_v36 = vadd.f32 %v209_v19, %v181_v31 }
  0xa4   :  { %v238_v22 = vpop.f32.mrf.mxu2 }
  0xa5   :  { %v1130_v42 = vadd.f32 %v238_v22, %v210_v36  ;;  %v525_v36 = vld [vmem:[%s1424_s5 + $0x178] sm:$0xff] }
  0xa6   :  { %588 = vmatpush.msrb.mxu2 %v525_v36 }
  0xa7   :  { %v183_v24 = vpop.f32.mrf.mxu0  ;;  %v294_v48 = vmul.f32 %v1130_v42, %v1130_v42  ;;  %v250_v52 = vsel %vm75_vm0, %v1130_v42, 0.0 }
  0xa8   :  { %v212_v25 = vpop.f32.mrf.mxu1  ;;  %v184_v27 = vadd.f32 %v806_v26, %v183_v24 }
  0xa9   :  { %v298_v57 = vsel %vm75_vm0, %v294_v48, 0.0  ;;  %v506_v48 = vld [vmem:[%s1424_s5 + $0xe0] sm:$0xff] }
  0xaa   :  { %v213_v33 = vadd.f32 %v212_v25, %v184_v27  ;;  %v354_v25 = vld [vmem:[%s1423_s10] sm:$0xf] }
  0xac   :  { %v241_v28 = vpop.f32.mrf.mxu2 }
  0xad   :  { %v1127_v40 = vadd.f32 %v241_v28, %v213_v33  ;;  %v509_v33 = vld [vmem:[%s1424_s5 + $0xf8] sm:$0xff] }
  0xae   :  { %559 = vmatpush.msrb.mxu1 %v509_v33  ;;  %v479_v33 = vld [vmem:[%s1424_s5 + $0x8] sm:$0xff] }
  0xaf   :  { %v186_v32 = vpop.f32.mrf.mxu0  ;;  %v295_v45 = vmul.f32 %v1127_v40, %v1127_v40  ;;  %v251_v49 = vsel %vm75_vm0, %v1127_v40, 0.0 }
  0xb0   :  { %v187_v34 = vadd.f32 %v806_v26, %v186_v32  ;;  %v215_v35 = vpop.f32.mrf.mxu1  ;;  %v252_v55 = vadd.f32 %v251_v49, %v250_v52 }
  0xb1   :  { %v299_v53 = vsel %vm75_vm0, %v295_v45, 0.0  ;;  %v524_v45 = vld [vmem:[%s1424_s5 + $0x170] sm:$0xff] }
  0xb2   :  { %v216_v39 = vadd.f32 %v215_v35, %v187_v34  ;;  %v300_v60 = vadd.f32 %v299_v53, %v298_v57  ;;  %v493_v34 = vld [vmem:[%s1424_s5 + $0x78] sm:$0xff]  ;;  %v508_v35 = vld [vmem:[%s1424_s5 + $0xf0] sm:$0xff]  ;;  %589 = vmatpush.msrb.mxu2 %v524_v45 }
  0xb3   :  { %530 = vmatpush.msrb.mxu0 %v493_v34  ;;  %560 = vmatpush.msrb.mxu1 %v508_v35  ;;  %v494_v34 = vld [vmem:[%s1424_s5 + $0x80] sm:$0xff]  ;;  %v511_v35 = vld [vmem:[%s1424_s5 + $0x108] sm:$0xff] }
  0xb4   :  { %v244_v41 = vpop.f32.mrf.mxu2 }
  0xb5   :  { %v1132_v43 = vadd.f32 %v244_v41, %v216_v39  ;;  %v492_v39 = vld [vmem:[%s1424_s5 + $0x70] sm:$0xff] }
  0xb6   :  { %531 = vmatpush.msrb.mxu0 %v492_v39  ;;  %v478_v39 = vld [vmem:[%s1424_s5] sm:$0xff] }
  0xb7   :  { %v189_v44 = vpop.f32.mrf.mxu0  ;;  %v296_v50 = vmul.f32 %v1132_v43, %v1132_v43  ;;  %v253_v54 = vsel %vm75_vm0, %v1132_v43, 0.0 }
  0xb8   :  { %v190_v46 = vadd.f32 %v806_v26, %v189_v44  ;;  %v218_v47 = vpop.f32.mrf.mxu1  ;;  %v254_v61 = vadd.f32 %v253_v54, %v252_v55  ;;  %v507_v44 = vld [vmem:[%s1424_s5 + $0xe8] sm:$0xff]  ;;  %v338_v54 = vld [vmem:[%s1425_s3] sm:$0x1] }
  0xb9   :  { %v301_v58 = vsel %vm75_vm0, %v296_v50, 0.0  ;;  %561 = vmatpush.msrb.mxu1 %v507_v44 }
  0xba   :  { %v219_v51 = vadd.f32 %v218_v47, %v190_v46  ;;  %v302_v0 = vadd.f32 %v301_v58, %v300_v60  ;;  %v491_v46 = vld [vmem:[%s1424_s5 + $0x68] sm:$0xff]  ;;  %v351_v60 = vld [vmem:[%s1426_s4] sm:$0x1] }
  0xbb   :  { %v523_v47 = vld [vmem:[%s1424_s5 + $0x168] sm:$0xff]  ;;  %532 = vmatpush.msrb.mxu0 %v491_v46  ;;  %562 = vmatpush.msrb.mxu1 %v506_v48 }
  0xbc   :  { %v247_v56 = vpop.f32.mrf.mxu2  ;;  %590 = vmatpush.msrb.mxu2 %v523_v47 }
  0xbd   :  { %v1150_v59 = vadd.f32 %v247_v56, %v219_v51 }
  0xbf   :  { %v255_v62 = vsel %vm75_vm0, %v1150_v59, 0.0  ;;  %v297_v63 = vmul.f32 %v1150_v59, %v1150_v59 }
  0xc0   :  { %v256_v1 = vadd.f32 %v255_v62, %v254_v61  ;;  %v490_v62 = vld [vmem:[%s1424_s5 + $0x60] sm:$0xff] }
  0xc1   :  { %v303_v2 = vsel %vm75_vm0, %v297_v63, 0.0  ;;  %533 = vmatpush.msrb.mxu0 %v490_v62  ;;  %v487_v63 = vld [vmem:[%s1424_s5 + $0x48] sm:$0xff] }
  0xc2   :  { %v257_v3 = vrot.slane %v256_v1, 4  ;;  %v304_v4 = vadd.f32 %v303_v2, %v302_v0  ;;  %v502_v0 = vld [vmem:[%s1424_s5 + $0xc0] sm:$0xff] }
  0xc3   :  { %v486_v2 = vld [vmem:[%s1424_s5 + $0x40] sm:$0xff] }
  0xc4   :  { %v305_v5 = vrot.slane %v304_v4, 4  ;;  %v258_v6 = vadd.f32 %v257_v3, %v256_v1  ;;  %v519_v1 = vld [vmem:[%s1424_s5 + $0x148] sm:$0xff]  ;;  %v501_v3 = vld [vmem:[%s1424_s5 + $0xb8] sm:$0xff] }
  0xc6   :  { %v306_v7 = vadd.f32 %v305_v5, %v304_v4  ;;  %v259_v8 = vrot.slane %v258_v6, 2  ;;  %v518_v4 = vld [vmem:[%s1424_s5 + $0x140] sm:$0xff]  ;;  %v485_v5 = vld [vmem:[%s1424_s5 + $0x38] sm:$0xff] }
  0xc8   :  { %v260_v9 = vadd.f32 %v259_v8, %v258_v6  ;;  %v307_v10 = vrot.slane %v306_v7, 2  ;;  %v500_v6 = vld [vmem:[%s1424_s5 + $0xb0] sm:$0xff] }
  0xc9   :  { %v484_v8 = vld [vmem:[%s1424_s5 + $0x30] sm:$0xff] }
  0xca   :  { %v261_v11 = vrot.slane %v260_v9, 1  ;;  %v308_v17 = vadd.f32 %v307_v10, %v306_v7  ;;  %v517_v7 = vld [vmem:[%s1424_s5 + $0x138] sm:$0xff]  ;;  %v516_v10 = vld [vmem:[%s1424_s5 + $0x130] sm:$0xff] }
  0xcc   :  { %v262_v12 = vadd.f32 %v261_v11, %v260_v9  ;;  %v309_v19 = vrot.slane %v308_v17, 1  ;;  %v499_v9 = vld [vmem:[%s1424_s5 + $0xa8] sm:$0xff] }
  0xcd   :  { %v483_v11 = vld [vmem:[%s1424_s5 + $0x28] sm:$0xff] }
  0xce   :  { %793 = vmatmul.msk.f32.vlgmr.msra.gmra.mxu3 %vm75_vm0, %v262_v12  ;;  %v310_v22 = vadd.f32 %v309_v19, %v308_v17  ;;  %v498_v12 = vld [vmem:[%s1424_s5 + $0xa0] sm:$0xff]  ;;  %v515_v17 = vld [vmem:[%s1424_s5 + $0x128] sm:$0xff] }
  0xcf   :  { %795 = vmatpush.msk.msra.mxu3 %vm359_vm5, %v354_v25  ;;  %v482_v19 = vld [vmem:[%s1424_s5 + $0x20] sm:$0xff] }
  0xd6   :  { %794 = vmatmul.msk.f32.vlgmr.msrb.gmra.mxu3 %vm75_vm0, %v310_v22  ;;  %v497_v22 = vld [vmem:[%s1424_s5 + $0x98] sm:$0xff] }
  0xd7   :  { %797 = vmatpush.msk.msrb.mxu3 %vm359_vm5, %v354_v25  ;;  %v481_v25 = vld [vmem:[%s1424_s5 + $0x18] sm:$0xff] }
 0x151   :  { %v291_v24 = vpop.f32.mrf.mxu3 }
 0x152   :  { %v334_v26 = vmul.f32 0.001953125, %v291_v24  ;;  %v514_v24 = vld [vmem:[%s1424_s5 + $0x120] sm:$0xff] }
 0x154   :  { %v336_v28 = vmul.f32 %v334_v26, %v334_v26 }
 0x159   :  { %v331_v27 = vpop.f32.mrf.mxu3 }
 0x15a   :  { %v335_v31 = vmul.f32 0.001953125, %v331_v27  ;;  %v513_v27 = vld [vmem:[%s1424_s5 + $0x118] sm:$0xff] }
 0x15c   :  { %v337_v32 = vsub.f32 %v335_v31, %v336_v28  ;;  %v480_v28 = vld [vmem:[%s1424_s5 + $0x10] sm:$0xff]  ;;  %v495_v31 = vld [vmem:[%s1424_s5 + $0x88] sm:$0xff] }
 0x15e   :  { %v339_v41 = vadd.f32 1e-05, %v337_v32  ;;  %v512_v32 = vld [vmem:[%s1424_s5 + $0x110] sm:$0xff] }
 0x160   :  { %808 = vrsqrt.f32 %v339_v41  ;;  %vm346_vm7 = vweird.f32 %v339_v41 }
 0x166   :  { %v809_v49 = vpop.eup %808 }
 0x167   :  { %v341_v50 = vmul.f32 %v809_v49, %v339_v41  ;;  %vm347_vm6 = vweird.f32 %v809_v49  ;;  %v510_v41 = vld [vmem:[%s1424_s5 + $0x100] sm:$0xff] }
 0x168   :  { %vm348_vm8 = vmor %vm346_vm7, %vm347_vm6 }
 0x169   :  { %v342_v51 = vmul.f32 %v809_v49, %v341_v50 }
 0x16b   :  { %v343_v52 = vmul.f32 0.5, %v342_v51  ;;  %v421_v51 = vstv %s1427_s11 }
 0x16d   :  { %v344_v53 = vsub.f32 1.5, %v343_v52 }
 0x16f   :  { %v345_v55 = vmul.f32 %v809_v49, %v344_v53 }
 0x171   :  { %v349_v56 = vsel %vm348_vm8, %v809_v49, %v345_v55 }
 0x172   :  { %v350_v57 = vmul.f32 %v349_v56, %v338_v54 }
 0x174   :  { %796 = vmatmul.msk.f32.vlgmr.msra.gmra.mxu3 %vm355_vm9, %v350_v57  ;;  %v352_v58 = vmul.f32 %v350_v57, %v334_v26  ;;  %v496_v26 = vld [vmem:[%s1424_s5 + $0x90] sm:$0xff] }
 0x175   :  { %649 = vmatpush.msra.mxu3 %v1073_v13 }
 0x176   :  { %v353_v61 = vsub.f32 %v351_v60, %v352_v58 }
 0x177   :  { %650 = vmatpush.msra.mxu3 %v1079_v14 }
 0x179   :  { %651 = vmatpush.msra.mxu3 %v1085_v15 }
 0x17b   :  { %652 = vmatpush.msra.mxu3 %v1091_v16 }
 0x17c   :  { %798 = vmatmul.msk.f32.vlgmr.msrb.gmra.mxu3 %vm355_vm9, %v353_v61 }
 0x17d   :  { %653 = vmatpush.msra.mxu3 %v1097_v18 }
 0x17f   :  { %654 = vmatpush.msra.mxu3 %v1103_v20 }
 0x181   :  { %655 = vmatpush.msra.mxu3 %v1109_v21 }
 0x183   :  { %656 = vmatpush.msra.mxu3 %v1115_v23 }
 0x185   :  { %689 = vmatpush.msrb.mxu3 %v1073_v13  ;;  %v505_v13 = vld [vmem:[%s1424_s5 + $0xd8] sm:$0xff] }
 0x186   :  { %563 = vmatpush.msrb.mxu1 %v505_v13 }
 0x187   :  { %690 = vmatpush.msrb.mxu3 %v1079_v14  ;;  %v522_v14 = vld [vmem:[%s1424_s5 + $0x160] sm:$0xff] }
 0x188   :  { %591 = vmatpush.msrb.mxu2 %v522_v14 }
 0x189   :  { %691 = vmatpush.msrb.mxu3 %v1085_v15  ;;  %v489_v15 = vld [vmem:[%s1424_s5 + $0x58] sm:$0xff] }
 0x18a   :  { %534 = vmatpush.msrb.mxu0 %v489_v15 }
 0x18b   :  { %692 = vmatpush.msrb.mxu3 %v1091_v16  ;;  %v504_v16 = vld [vmem:[%s1424_s5 + $0xd0] sm:$0xff] }
 0x18c   :  { %564 = vmatpush.msrb.mxu1 %v504_v16 }
 0x18d   :  { %693 = vmatpush.msrb.mxu3 %v1097_v18  ;;  %v521_v18 = vld [vmem:[%s1424_s5 + $0x158] sm:$0xff] }
 0x18e   :  { %592 = vmatpush.msrb.mxu2 %v521_v18 }
 0x18f   :  { %694 = vmatpush.msrb.mxu3 %v1103_v20  ;;  %v488_v20 = vld [vmem:[%s1424_s5 + $0x50] sm:$0xff] }
 0x190   :  { %535 = vmatpush.msrb.mxu0 %v488_v20 }
 0x191   :  { %695 = vmatpush.msrb.mxu3 %v1109_v21  ;;  %v503_v21 = vld [vmem:[%s1424_s5 + $0xc8] sm:$0xff] }
 0x192   :  { %565 = vmatpush.msrb.mxu1 %v503_v21  ;;  %536 = vmatpush.msrb.mxu0 %v487_v63 }
 0x193   :  { %696 = vmatpush.msrb.mxu3 %v1115_v23  ;;  %v520_v23 = vld [vmem:[%s1424_s5 + $0x150] sm:$0xff] }
 0x194   :  { %593 = vmatpush.msrb.mxu2 %v520_v23  ;;  %566 = vmatpush.msrb.mxu1 %v502_v0 }
 0x195   :  { %537 = vmatpush.msrb.mxu0 %v486_v2 }
 0x196   :  { %594 = vmatpush.msrb.mxu2 %v519_v1  ;;  %567 = vmatpush.msrb.mxu1 %v501_v3 }
 0x197   :  { %538 = vmatpush.msrb.mxu0 %v485_v5 }
 0x198   :  { %595 = vmatpush.msrb.mxu2 %v518_v4  ;;  %568 = vmatpush.msrb.mxu1 %v500_v6 }
 0x199   :  { %539 = vmatpush.msrb.mxu0 %v484_v8 }
 0x19a   :  { %596 = vmatpush.msrb.mxu2 %v517_v7  ;;  %569 = vmatpush.msrb.mxu1 %v499_v9 }
 0x19b   :  { %540 = vmatpush.msrb.mxu0 %v483_v11 }
 0x19c   :  { %597 = vmatpush.msrb.mxu2 %v516_v10  ;;  %570 = vmatpush.msrb.mxu1 %v498_v12 }
 0x19d   :  { %541 = vmatpush.msrb.mxu0 %v482_v19 }
 0x19e   :  { %598 = vmatpush.msrb.mxu2 %v515_v17  ;;  %571 = vmatpush.msrb.mxu1 %v497_v22 }
 0x19f   :  { %542 = vmatpush.msrb.mxu0 %v481_v25 }
 0x1a0   :  { %599 = vmatpush.msrb.mxu2 %v514_v24  ;;  %572 = vmatpush.msrb.mxu1 %v496_v26 }
 0x1a1   :  { %543 = vmatpush.msrb.mxu0 %v480_v28 }
 0x1a2   :  { %600 = vmatpush.msrb.mxu2 %v513_v27  ;;  %573 = vmatpush.msrb.mxu1 %v495_v31  ;;  %v807_v27 = vld [vmem:[%s1428_s6] ss:$0 sm:$0xff] }
 0x1a3   :  { %544 = vmatpush.msrb.mxu0 %v479_v33 }
 0x1a4   :  { %601 = vmatpush.msrb.mxu2 %v512_v32  ;;  %574 = vmatpush.msrb.mxu1 %v494_v34 }
 0x1a5   :  { %545 = vmatpush.msrb.mxu0 %v478_v39 }
 0x1a6   :  { %602 = vmatpush.msrb.mxu2 %v511_v35 }
 0x1a8   :  { %603 = vmatpush.msrb.mxu2 %v510_v41 }
 0x1f7   :  { %v380_v36 = vpop.f32.mrf.mxu3 }
 0x1f8   :  { %v406_v44 = vperm.slane %v380_v36, 0 }
 0x1fa   :  { %v407_v45 = vmul.f32 %v406_v44, %v1130_v42  ;;  %v408_v47 = vmul.f32 %v406_v44, %v1127_v40  ;;  %v409_v48 = vmul.f32 %v406_v44, %v1132_v43  ;;  %v410_v49 = vmul.f32 %v406_v44, %v1150_v59 }
 0x1ff   :  { %v403_v46 = vpop.f32.mrf.mxu3 }
 0x200   :  { %v411_v50 = vperm.slane %v403_v46, 0 }
 0x202   :  { %v412_v52 = vadd.f32 %v411_v50, %v407_v45  ;;  %v413_v53 = vadd.f32 %v411_v50, %v408_v47  ;;  %v414_v54 = vadd.f32 %v411_v50, %v409_v48  ;;  %v415_v55 = vadd.f32 %v411_v50, %v410_v49 }
 0x204   :  { %vm417_vm10 = vcmp.ge.f32.partialorder %v412_v52, 0.0  ;;  %vm418_vm11 = vcmp.ge.f32.partialorder %v413_v53, 0.0  ;;  %vm419_vm12 = vcmp.ge.f32.partialorder %v414_v54, 0.0  ;;  %vm420_vm13 = vcmp.ge.f32.partialorder %v415_v55, 0.0 }
 0x205   :  { %v422_v42 = vmul.f32 %v421_v51, %v412_v52  ;;  %v423_v56 = vmul.f32 %v421_v51, %v413_v53  ;;  %v424_v40 = vmul.f32 %v421_v51, %v414_v54  ;;  %v425_v57 = vmul.f32 %v421_v51, %v415_v55 }
 0x207   :  { %v426_v43 = vsel %vm417_vm10, %v412_v52, %v422_v42  ;;  %v427_v58 = vsel %vm418_vm11, %v413_v53, %v423_v56  ;;  %v428_v59 = vsel %vm419_vm12, %v414_v54, %v424_v40  ;;  %v429_v60 = vsel %vm420_vm13, %v415_v55, %v425_v57 }
 0x208   :  { %v434_v61 = vrot.slane %v426_v43, 7  ;;  %v435_v62 = vrot.slane %v427_v58, 7  ;;  %v437_v13 = vrot.slane %v428_v59, 7  ;;  %v438_v14 = vrot.slane %v429_v60, 7  ;;  %448 = vst.msk [vmem:[#allocation2 + $0x8] sm:$0xff] %vm75_vm0, %v426_v43 }
 0x209   :  { %449 = vst.msk [vmem:[#allocation2 + $0x20] sm:$0xff] %vm75_vm0, %v427_v58  ;;  %v452_v15 = vrot.slane %v426_v43, 1  ;;  %v453_v16 = vrot.slane %v427_v58, 1  ;;  %v455_v21 = vrot.slane %v428_v59, 1  ;;  %v456_v23 = vrot.slane %v429_v60, 1 }
 0x20a   :  { %v436_v18 = vsel %vm62_vm4, %v434_v61, %v435_v62  ;;  %v439_v20 = vsel %vm62_vm4, %v437_v13, %v438_v14  ;;  %444 = vst.msk [vmem:[#allocation2] sm:$0xfe] %vm73_vm2, %v434_v61 }
 0x20b   :  { %445 = vst.msk [vmem:[#allocation2 + $0x18] sm:$0xff] %vm75_vm0, %v436_v18  ;;  %v454_v63 = vsel %vm83_vm1, %v452_v15, %v453_v16  ;;  %v457_v0 = vsel %vm83_vm1, %v455_v21, %v456_v23 }
 0x20c   :  { %446 = vst.msk [vmem:[#allocation2 + $0x30] sm:$0xfe] %vm73_vm2, %v437_v13 }
 0x20d   :  { %447 = vst.msk [vmem:[#allocation2 + $0x48] sm:$0xff] %vm75_vm0, %v439_v20 }
 0x20e   :  { %450 = vst.msk [vmem:[#allocation2 + $0x38] sm:$0xff] %vm75_vm0, %v428_v59 }
 0x20f   :  { %451 = vst.msk [vmem:[#allocation2 + $0x50] sm:$0xff] %vm75_vm0, %v429_v60  ;;  %v467_v1 = vld [vmem:[#allocation2 + $0x8] sm:$0xff] }
 0x210   :  { %462 = vst.msk [vmem:[#allocation2 + $0x10] sm:$0xff] %vm75_vm0, %v454_v63  ;;  %575 = vmatmul.f32.vlgmr.msrb.gmra.mxu1 %v467_v1  ;;  %v470_v4 = vld [vmem:[#allocation2 + $0x20] sm:$0xff] }
 0x211   :  { %463 = vst.msk [vmem:[#allocation2 + $0x28] sm:$0x7f] %vm95_vm3, %v453_v16  ;;  %v466_v2 = vld [vmem:[#allocation2] sm:$0xff] }
 0x212   :  { %464 = vst.msk [vmem:[#allocation2 + $0x40] sm:$0xff] %vm75_vm0, %v457_v0  ;;  %546 = vmatmul.f32.vlgmr.msrb.gmra.mxu0 %v466_v2  ;;  %v469_v5 = vld [vmem:[#allocation2 + $0x18] sm:$0xff] }
 0x213   :  { %465 = vst.msk [vmem:[#allocation2 + $0x58] sm:$0x7f] %vm95_vm3, %v456_v23  ;;  %v472_v8 = vld [vmem:[#allocation2 + $0x30] sm:$0xff] }
 0x214   :  { %v475_v11 = vld [vmem:[#allocation2 + $0x48] sm:$0xff] }
 0x215   :  { %v473_v7 = vld [vmem:[#allocation2 + $0x38] sm:$0xff] }
 0x216   :  { %v476_v10 = vld [vmem:[#allocation2 + $0x50] sm:$0xff] }
 0x217   :  { %v468_v3 = vld [vmem:[#allocation2 + $0x10] sm:$0xff] }
 0x218   :  { %604 = vmatmul.f32.vlgmr.msrb.gmra.mxu2 %v468_v3  ;;  %578 = vmatmul.f32.gmra.mxu1 %v470_v4  ;;  %v471_v6 = vld [vmem:[#allocation2 + $0x28] sm:$0xff] }
 0x219   :  { %v474_v9 = vld [vmem:[#allocation2 + $0x40] sm:$0xff] }
 0x21a   :  { %549 = vmatmul.f32.gmra.mxu0 %v469_v5  ;;  %v477_v12 = vld [vmem:[#allocation2 + $0x58] sm:$0xff] }
 0x220   :  { %607 = vmatmul.f32.gmra.mxu2 %v471_v6  ;;  %581 = vmatmul.f32.gmra.mxu1 %v473_v7 }
 0x222   :  { %552 = vmatmul.f32.gmra.mxu0 %v472_v8 }
 0x228   :  { %610 = vmatmul.f32.gmra.mxu2 %v474_v9  ;;  %584 = vmatmul.f32.gmra.mxu1 %v476_v10  ;;  %v721_v9 = vld [vmem:[%s1423_s10] sm:$0xf] }
 0x229   :  { %803 = vmatpush.msk.msra.mxu0 %vm359_vm5, %v721_v9 }
 0x22a   :  { %555 = vmatmul.f32.gmra.mxu0 %v475_v11 }
 0x230   :  { %613 = vmatmul.f32.gmra.mxu2 %v477_v12 }
 0x28d   :  { %v576_v19 = vpop.f32.mrf.mxu1 }
 0x28f   :  { %v547_v17 = vpop.f32.mrf.mxu0 }
 0x290   :  { %v548_v32 = vadd.f32 %v807_v27, %v547_v17 }
 0x292   :  { %v577_v36 = vadd.f32 %v576_v19, %v548_v32 }
 0x295   :  { %v579_v25 = vpop.f32.mrf.mxu1 }
 0x297   :  { %v550_v22 = vpop.f32.mrf.mxu0 }
 0x298   :  { %v551_v31 = vadd.f32 %v807_v27, %v550_v22 }
 0x29a   :  { %v580_v35 = vadd.f32 %v579_v25, %v551_v31  ;;  %v705_v31 = vld [vmem:[%s1429_s7] sm:$0x1] }
 0x29b   :  { %v605_v24 = vpop.f32.mrf.mxu2 }
 0x29c   :  { %v1360_v46 = vadd.f32 %v605_v24, %v577_v36 }
 0x29d   :  { %v582_v34 = vpop.f32.mrf.mxu1 }
 0x29e   :  { %v661_v50 = vmul.f32 %v1360_v46, %v1360_v46  ;;  %v617_v54 = vsel %vm75_vm0, %v1360_v46, 0.0 }
 0x29f   :  { %v553_v26 = vpop.f32.mrf.mxu0 }
 0x2a0   :  { %v554_v33 = vadd.f32 %v807_v27, %v553_v26  ;;  %v665_v43 = vsel %vm75_vm0, %v661_v50, 0.0 }
 0x2a2   :  { %v583_v41 = vadd.f32 %v582_v34, %v554_v33 }
 0x2a3   :  { %v608_v28 = vpop.f32.mrf.mxu2 }
 0x2a4   :  { %v1358_v39 = vadd.f32 %v608_v28, %v580_v35  ;;  %v718_v35 = vld [vmem:[%s1430_s8] sm:$0x1] }
 0x2a5   :  { %v585_v53 = vpop.f32.mrf.mxu1 }
 0x2a6   :  { %v662_v48 = vmul.f32 %v1358_v39, %v1358_v39  ;;  %v618_v51 = vsel %vm75_vm0, %v1358_v39, 0.0 }
 0x2a7   :  { %v556_v45 = vpop.f32.mrf.mxu0  ;;  %v619_v40 = vadd.f32 %v618_v51, %v617_v54 }
 0x2a8   :  { %v557_v49 = vadd.f32 %v807_v27, %v556_v45  ;;  %v666_v55 = vsel %vm75_vm0, %v662_v48, 0.0 }
 0x2a9   :  { %v667_v60 = vadd.f32 %v666_v55, %v665_v43 }
 0x2aa   :  { %v586_v56 = vadd.f32 %v585_v53, %v557_v49 }
 0x2ab   :  { %v611_v44 = vpop.f32.mrf.mxu2 }
 0x2ac   :  { %v1362_v47 = vadd.f32 %v611_v44, %v583_v41 }
 0x2ae   :  { %v663_v52 = vmul.f32 %v1362_v47, %v1362_v47  ;;  %v620_v42 = vsel %vm75_vm0, %v1362_v47, 0.0 }
 0x2af   :  { %v621_v61 = vadd.f32 %v620_v42, %v619_v40 }
 0x2b0   :  { %v668_v58 = vsel %vm75_vm0, %v663_v52, 0.0 }
 0x2b1   :  { %v669_v14 = vadd.f32 %v668_v58, %v667_v60 }
 0x2b3   :  { %v614_v57 = vpop.f32.mrf.mxu2 }
 0x2b4   :  { %v615_v59 = vadd.f32 %v614_v57, %v586_v56 }
 0x2b6   :  { %v622_v62 = vsel %vm75_vm0, %v615_v59, 0.0  ;;  %v664_v13 = vmul.f32 %v615_v59, %v615_v59 }
 0x2b7   :  { %v623_v15 = vadd.f32 %v622_v62, %v621_v61 }
 0x2b8   :  { %v670_v16 = vsel %vm75_vm0, %v664_v13, 0.0 }
 0x2b9   :  { %v624_v18 = vrot.slane %v623_v15, 4  ;;  %v671_v20 = vadd.f32 %v670_v16, %v669_v14 }
 0x2bb   :  { %v625_v21 = vadd.f32 %v624_v18, %v623_v15  ;;  %v672_v23 = vrot.slane %v671_v20, 4 }
 0x2bd   :  { %v626_v63 = vrot.slane %v625_v21, 2  ;;  %v673_v0 = vadd.f32 %v672_v23, %v671_v20 }
 0x2bf   :  { %v627_v1 = vadd.f32 %v626_v63, %v625_v21  ;;  %v674_v2 = vrot.slane %v673_v0, 2 }
 0x2c1   :  { %v628_v3 = vrot.slane %v627_v1, 1  ;;  %v675_v4 = vadd.f32 %v674_v2, %v673_v0 }
 0x2c3   :  { %v629_v5 = vadd.f32 %v628_v3, %v627_v1  ;;  %v676_v6 = vrot.slane %v675_v4, 1 }
 0x2c5   :  { %799 = vmatmul.msk.f32.vlgmr.msra.gmra.mxu3 %vm75_vm0, %v629_v5  ;;  %v677_v7 = vadd.f32 %v676_v6, %v675_v4 }
 0x2c6   :  { %801 = vmatpush.msk.msra.mxu3 %vm359_vm5, %v721_v9 }
 0x2cd   :  { %800 = vmatmul.msk.f32.vlgmr.msrb.gmra.mxu3 %vm75_vm0, %v677_v7 }
 0x348   :  { %v658_v8 = vpop.f32.mrf.mxu3 }
 0x349   :  { %v701_v10 = vmul.f32 0.001953125, %v658_v8 }
 0x34b   :  { %v703_v12 = vmul.f32 %v701_v10, %v701_v10 }
 0x350   :  { %v698_v11 = vpop.f32.mrf.mxu3 }
 0x351   :  { %v702_v17 = vmul.f32 0.001953125, %v698_v11 }
 0x353   :  { %v704_v19 = vsub.f32 %v702_v17, %v703_v12 }
 0x355   :  { %v706_v22 = vadd.f32 1e-05, %v704_v19 }
 0x357   :  { %810 = vrsqrt.f32 %v706_v22  ;;  %vm713_vm15 = vweird.f32 %v706_v22 }
 0x35d   :  { %v811_v24 = vpop.eup %810 }
 0x35e   :  { %v708_v25 = vmul.f32 %v811_v24, %v706_v22  ;;  %vm714_vm14 = vweird.f32 %v811_v24 }
 0x35f   :  { %vm715_vm1 = vmor %vm713_vm15, %vm714_vm14 }
 0x360   :  { %v709_v26 = vmul.f32 %v811_v24, %v708_v25 }
 0x362   :  { %v710_v27 = vmul.f32 0.5, %v709_v26 }
 0x364   :  { %v711_v28 = vsub.f32 1.5, %v710_v27 }
 0x366   :  { %v712_v32 = vmul.f32 %v811_v24, %v711_v28 }
 0x368   :  { %v716_v33 = vsel %vm715_vm1, %v811_v24, %v712_v32 }
 0x369   :  { %v717_v34 = vmul.f32 %v716_v33, %v705_v31 }
 0x36b   :  { %v719_v36 = vmul.f32 %v717_v34, %v701_v10  ;;  %802 = vmatmul.msk.f32.vlgmr.msra.gmra.mxu3 %vm355_vm9, %v717_v34 }
 0x36d   :  { %v720_v41 = vsub.f32 %v718_v35, %v719_v36 }
 0x36f   :  { %804 = vmatmul.msk.f32.vlgmr.msra.gmra.mxu0 %vm355_vm9, %v720_v41 }
 0x3ec   :  { %v768_v44 = vpop.f32.mrf.mxu0 }
 0x3ed   :  { %v776_v49 = vperm.slane %v768_v44, 0 }
 0x3ee   :  { %v745_v45 = vpop.f32.mrf.mxu3 }
 0x3ef   :  { %v771_v48 = vperm.slane %v745_v45, 0 }
 0x3f1   :  { %v772_v50 = vmul.f32 %v771_v48, %v1360_v46  ;;  %v773_v51 = vmul.f32 %v771_v48, %v1358_v39  ;;  %v774_v52 = vmul.f32 %v771_v48, %v1362_v47  ;;  %v775_v53 = vmul.f32 %v771_v48, %v615_v59 }
 0x3f3   :  { %v777_v54 = vadd.f32 %v776_v49, %v772_v50  ;;  %v778_v55 = vadd.f32 %v776_v49, %v773_v51  ;;  %v779_v42 = vadd.f32 %v776_v49, %v774_v52  ;;  %v780_v56 = vadd.f32 %v776_v49, %v775_v53 }
 0x3f5   :  { %v781_v40 = vadd.f32 %v777_v54, %v965_v29  ;;  %v782_v57 = vadd.f32 %v778_v55, %v970_v30  ;;  %v783_v43 = vadd.f32 %v779_v42, %v989_v37  ;;  %v784_v58 = vadd.f32 %v780_v56, %v994_v38 }
 0x3f7   :  { %785 = vst.msk [vmem:[%s1431_s12] sm:$0xff] %vm75_vm0, %v781_v40 }
 0x3f8   :  { %786 = vst.msk [vmem:[%s1431_s12 + $0x8] sm:$0xff] %vm75_vm0, %v782_v57 }
 0x3f9   :  { %787 = vst.msk [vmem:[%s1431_s12 + $0x10] sm:$0xff] %vm75_vm0, %v783_v43 }
 0x3fa   :  { %788 = vst.msk [vmem:[%s1431_s12 + $0x18] sm:$0xff] %vm75_vm0, %v784_v58 }

</bundles_post_ra>
